<compile_context>
chip_gen: v7x
topology: tpu7x:2x2x1
jax: 0.10.0
libtpu: 0.0.40
codegen_flags: <defaults>
</compile_context>

<pallas_src>
import functools

import numpy as np
import jax
import jax.numpy as jnp
from jax import lax
from jax.experimental import pallas as pl
from jax.experimental.pallas import tpu as pltpu


H = W = 4            # conv input spatial size implied by fc1 = Linear(32*2*2, 2)
PH = PW = 2          # pooled spatial size
S = PH * PW          # pooled positions per image (4)
NWIN = 4             # positions inside one 2x2 pool window
C_PAD = 8            # classes padded to 8 sublanes for the transposed, lane-dense output


def cnn_kernel(x_ref, wconv_ref, bconv_ref, wfcT_ref, bfcT_ref, out_ref):
    """Fused conv (4 window matmuls + running max) + bias + ReLU + transposed FC head."""
    x = x_ref[...]                                      # (tile_b, Cin*16)
    n_feat = wconv_ref.shape[-1]
    seg = n_feat // NWIN                                # = S*Cout = 128 lanes per window pos.

    # Conv as matmuls, one per 2x2 pool-window position (lanes already grouped per window in
    # the fused weight); the maxpool is a running max, so the live f32 block is tile_b x 128.
    acc = None
    for j in range(NWIN):
        part = jnp.dot(x, wconv_ref[:, j * seg:(j + 1) * seg],
                       preferred_element_type=jnp.float32)
        acc = part if acc is None else jnp.maximum(acc, part)
    # ReLU commutes with max, so bias + ReLU applied once on the pooled result (f32, VPU).
    pooled = jnp.maximum(acc + bconv_ref[...], 0.0)     # (tile_b, 128), lane = s*Cout + c

    # FC head, transposed: (C_PAD, tile_b) = (C_PAD, 128) @ (128, tile_b).
    # Batch on lanes -> lane-dense store, 16x less writeback than a (tile_b, 128) f32 block.
    out = jnp.dot(wfcT_ref[...], pooled.T, preferred_element_type=jnp.float32) + bfcT_ref[...]
    out_ref[...] = out.astype(out_ref.dtype)


@functools.lru_cache(maxsize=None)
def _im2col_operator(cin):
    """Constant 0/1 matrix G (Cin*16, NWIN*S*Cin*9): column p*Cin*9 + c*9 + kh*3 + kw selects
    the input pixel feeding conv-output position p (p = j*S + s; j = pool-window position,
    s = pooled position) at tap (c, kh, kw) for a 3x3 'same' conv on a 4x4 image."""
    G = np.zeros((cin * H * W, NWIN * S * cin * 9), np.float32)
    for p in range(NWIN * S):
        j, s = p // S, p % S
        dh, dw = j // 2, j % 2
        ph, pw = s // PW, s % PW
        ho, wo = 2 * ph + dh, 2 * pw + dw
        for c in range(cin):
            for kh in range(3):
                for kw in range(3):
                    hi, wi = ho + kh - 1, wo + kw - 1
                    if 0 <= hi < H and 0 <= wi < W:
                        G[c * H * W + hi * W + wi, p * cin * 9 + c * 9 + kh * 3 + kw] = 1.0
    return G


def prepare_cnn_params(w_conv, b_conv, w_fc, b_fc, *, compute_dtype=jnp.bfloat16):
    """Fold im2col into the conv weight and lay the FC head out transposed.
    Call once per set of weights; reuse the result for every forward step."""
    Cout, Cin = w_conv.shape[0], w_conv.shape[1]
    n_classes = w_fc.shape[0]
    assert n_classes <= C_PAD
    n_feat = NWIN * S * Cout                  # 512 conv outputs / image, lane order (j, s, c)
    n_fc_in = S * Cout                        # 128

    G = jnp.asarray(_im2col_operator(Cin))                          # (Cin*16, NWIN*S*Cin*9)
    wc2 = w_conv.reshape(Cout, Cin * 9).T.astype(jnp.float32)       # (Cin*9, Cout)
    w_eff = jnp.einsum('rpk,ko->rpo',
                       G.reshape(Cin * H * W, NWIN * S, Cin * 9),
                       wc2).reshape(Cin * H * W, n_feat)            # (Cin*16, 512)
    bc = jnp.tile(b_conv, S)[None, :].astype(jnp.float32)           # (1, 128): lane = s*Cout+c

    # pooled lane s*Cout + c  <->  PyTorch NCHW-flatten feature c*S + s
    wk = jnp.transpose(w_fc.reshape(n_classes, Cout, S), (2, 1, 0)).reshape(n_fc_in, n_classes)
    wfcT = jnp.pad(wk.T, ((0, C_PAD - n_classes), (0, 0))).astype(jnp.float32)   # (8, 128)
    bfcT = jnp.pad(b_fc, (0, C_PAD - n_classes))[:, None].astype(jnp.float32)    # (8, 1)

    return w_eff.astype(compute_dtype), bc, wfcT, bfcT, n_classes


def _pick_tile(batch, tile_b):
    b8 = 8 * pl.cdiv(batch, 8)
    if b8 < 256:
        return b8                                    # single tile; block dims = full extents
    req = max(128, (int(tile_b) // 128) * 128)       # lane-dense output => tile % 128 == 0
    half = (b8 // 2) // 128 * 128                    # keep grid >= 2 for v7x megacore
    return min(req, max(128, half))


@functools.partial(jax.jit, static_argnames=("tile_b",))
def _cnn_apply(x, w_eff, bc, wfcT, bfcT, *, tile_b):
    B = x.shape[0]
    k_in, n_feat = w_eff.shape
    n_fc_in = wfcT.shape[1]
    tile = _pick_tile(B, tile_b)
    b_pad = tile * pl.cdiv(B, tile)

    x_flat = x.reshape(B, -1).astype(w_eff.dtype)
    if b_pad != B:
        x_flat = jnp.pad(x_flat, ((0, b_pad - B), (0, 0)))

    out_t = pl.pallas_call(
        cnn_kernel,
        out_shape=jax.ShapeDtypeStruct((C_PAD, b_pad), jnp.float32),
        grid=(b_pad // tile,),
        in_specs=[
            pl.BlockSpec((tile, k_in), lambda i: (i, 0)),        # x tile
            pl.BlockSpec((k_in, n_feat), lambda i: (0, 0)),      # fused conv weight (64, 512)
            pl.BlockSpec((1, n_fc_in), lambda i: (0, 0)),        # conv bias (1, 128)
            pl.BlockSpec((C_PAD, n_fc_in), lambda i: (0, 0)),    # transposed FC weight (8, 128)
            pl.BlockSpec((C_PAD, 1), lambda i: (0, 0)),          # transposed FC bias (8, 1)
        ],
        out_specs=pl.BlockSpec((C_PAD, tile), lambda i: (0, i)),
        compiler_params=pltpu.CompilerParams(
            dimension_semantics=("parallel",),
            vmem_limit_bytes=32 * 1024 * 1024),
    )(x_flat, w_eff, bc, wfcT, bfcT)
    return out_t                                                 # (C_PAD, b_pad) f32


def cnn_forward_pallas(x, w_conv, b_conv, w_fc, b_fc, *,
                       tile_b=1024, compute_dtype=jnp.bfloat16):
    """x: (B, Cin, 4, 4) NCHW. Returns (B, n_classes) float32."""
    B = x.shape[0]
    assert x.shape[2:] == (H, W), "fc1 = Linear(32*2*2, 2) pins the conv input to 4x4"
    w_eff, bc, wfcT, bfcT, n_classes = prepare_cnn_params(
        w_conv, b_conv, w_fc, b_fc, compute_dtype=compute_dtype)
    out_t = _cnn_apply(x, w_eff, bc, wfcT, bfcT, tile_b=int(tile_b))
    return out_t[:n_classes, :B].T


def cnn_forward_ref(x, w_conv, b_conv, w_fc, b_fc):
    """Pure-JAX reference matching the PyTorch forward."""
    conv = lax.conv_general_dilated(
        x, w_conv, window_strides=(1, 1), padding="SAME",
        dimension_numbers=("NCHW", "OIHW", "NCHW"))
    act = jnp.maximum(conv + b_conv[None, :, None, None], 0.0)
    pooled = lax.reduce_window(act, -jnp.inf, lax.max,
                               (1, 1, 2, 2), (1, 1, 2, 2), "VALID")
    return pooled.reshape(x.shape[0], -1) @ w_fc.T + b_fc


if __name__ == "__main__":
    # fc1 expects 32*2*2 features => spatial 4x4 input. Pick B=2, Cin=4.
    B, Cin = 2, 4
    Cout, n_classes = 32, 2

    key = jax.random.PRNGKey(0)
    kx, kw1, kb1, kw2, kb2 = jax.random.split(key, 5)
    x = jax.random.normal(kx, (B, Cin, H, W), dtype=jnp.float32)
    w_conv = jax.random.normal(kw1, (Cout, Cin, 3, 3), dtype=jnp.float32) * 0.1
    b_conv = jax.random.normal(kb1, (Cout,), dtype=jnp.float32) * 0.1
    w_fc = jax.random.normal(kw2, (n_classes, Cout * PH * PW), dtype=jnp.float32) * 0.1
    b_fc = jax.random.normal(kb2, (n_classes,), dtype=jnp.float32) * 0.1

    ref = cnn_forward_ref(x, w_conv, b_conv, w_fc, b_fc)

    # f32 operand path: tight tolerance.
    out_f32 = jax.block_until_ready(
        cnn_forward_pallas(x, w_conv, b_conv, w_fc, b_fc, compute_dtype=jnp.float32))
    assert out_f32.shape == (B, n_classes)
    assert jnp.allclose(out_f32, ref, atol=1e-4, rtol=1e-4), (out_f32, ref)

    # default bf16-operand path (f32 accumulate): looser tolerance.
    out_bf16 = jax.block_until_ready(cnn_forward_pallas(x, w_conv, b_conv, w_fc, b_fc))
    assert out_bf16.shape == (B, n_classes)
    assert jnp.allclose(out_bf16, ref, atol=3e-2, rtol=3e-2), (out_bf16, ref)

    # multi-tile / padded-batch path (grid > 1, exercises the "parallel" batch axis).
    B2 = 260
    x2 = jax.random.normal(jax.random.PRNGKey(1), (B2, Cin, H, W), dtype=jnp.float32)
    out2 = jax.block_until_ready(cnn_forward_pallas(x2, w_conv, b_conv, w_fc, b_fc))
    ref2 = cnn_forward_ref(x2, w_conv, b_conv, w_fc, b_fc)
    assert out2.shape == (B2, n_classes)
    assert jnp.allclose(out2, ref2, atol=3e-2, rtol=3e-2), "multi-tile mismatch"

    print("KERNEL_OK")
</pallas_src>

<mosaic_0001>
module attributes {stable_mosaic.version = 11 : i64} {
  func.func @cnn_kernel(%arg0: i32, %arg1: memref<8x64xf32, #tpu.memory_space<vmem>>, %arg2: memref<64x512xf32, #tpu.memory_space<vmem>>, %arg3: memref<1x128xf32, #tpu.memory_space<vmem>>, %arg4: memref<8x128xf32, #tpu.memory_space<vmem>>, %arg5: memref<8x1xf32, #tpu.memory_space<vmem>>, %arg6: memref<8x8xf32, #tpu.memory_space<vmem>>) attributes {dimension_semantics = [#tpu.dimension_semantics<parallel>], iteration_bounds = array<i64: 1>, scalar_prefetch = 0 : i64, scratch_operands = 0 : i64, tpu.core_type = #tpu.core_type<tc>, window_params = [{transform_indices = @transform_0, window_bounds = array<i64: 8, 64>}, {pipeline_mode = #tpu.pipeline_mode<synchronous>, transform_indices = @transform_1, window_bounds = array<i64: 64, 512>}, {pipeline_mode = #tpu.pipeline_mode<synchronous>, transform_indices = @transform_2, window_bounds = array<i64: 1, 128>}, {pipeline_mode = #tpu.pipeline_mode<synchronous>, transform_indices = @transform_3, window_bounds = array<i64: 8, 128>}, {pipeline_mode = #tpu.pipeline_mode<synchronous>, transform_indices = @transform_4, window_bounds = array<i64: 8, 1>}, {transform_indices = @transform_5, window_bounds = array<i64: 8, 8>}]} {
    %c0 = arith.constant 0 : index
    %c0_0 = arith.constant 0 : index
    %0 = vector.load %arg1[%c0, %c0_0] : memref<8x64xf32, #tpu.memory_space<vmem>>, vector<8x64xf32>
    %c0_1 = arith.constant 0 : index
    %c0_2 = arith.constant 0 : index
    %1 = vector.load %arg2[%c0_1, %c0_2] : memref<64x512xf32, #tpu.memory_space<vmem>>, vector<64x128xf32>
    %cst = arith.constant dense<0.000000e+00> : vector<8x128xf32>
    %2 = tpu.matmul %0, %1, %cst {dimension_numbers = #tpu.dot_dimension_numbers<[1], [0], [0], [1], [0, 0, 1, 1], [], []>} : vector<8x64xf32>, vector<64x128xf32>, vector<8x128xf32> -> vector<8x128xf32>
    %c0_3 = arith.constant 0 : index
    %c128 = arith.constant 128 : index
    %3 = vector.load %arg2[%c0_3, %c128] : memref<64x512xf32, #tpu.memory_space<vmem>>, vector<64x128xf32>
    %cst_4 = arith.constant dense<0.000000e+00> : vector<8x128xf32>
    %4 = tpu.matmul %0, %3, %cst_4 {dimension_numbers = #tpu.dot_dimension_numbers<[1], [0], [0], [1], [0, 0, 1, 1], [], []>} : vector<8x64xf32>, vector<64x128xf32>, vector<8x128xf32> -> vector<8x128xf32>
    %5 = arith.maximumf %2, %4 : vector<8x128xf32>
    %c0_5 = arith.constant 0 : index
    %c256 = arith.constant 256 : index
    %6 = vector.load %arg2[%c0_5, %c256] : memref<64x512xf32, #tpu.memory_space<vmem>>, vector<64x128xf32>
    %cst_6 = arith.constant dense<0.000000e+00> : vector<8x128xf32>
    %7 = tpu.matmul %0, %6, %cst_6 {dimension_numbers = #tpu.dot_dimension_numbers<[1], [0], [0], [1], [0, 0, 1, 1], [], []>} : vector<8x64xf32>, vector<64x128xf32>, vector<8x128xf32> -> vector<8x128xf32>
    %8 = arith.maximumf %5, %7 : vector<8x128xf32>
    %c0_7 = arith.constant 0 : index
    %c384 = arith.constant 384 : index
    %9 = vector.load %arg2[%c0_7, %c384] : memref<64x512xf32, #tpu.memory_space<vmem>>, vector<64x128xf32>
    %cst_8 = arith.constant dense<0.000000e+00> : vector<8x128xf32>
    %10 = tpu.matmul %0, %9, %cst_8 {dimension_numbers = #tpu.dot_dimension_numbers<[1], [0], [0], [1], [0, 0, 1, 1], [], []>} : vector<8x64xf32>, vector<64x128xf32>, vector<8x128xf32> -> vector<8x128xf32>
    %11 = arith.maximumf %8, %10 : vector<8x128xf32>
    %c0_9 = arith.constant 0 : index
    %c0_10 = arith.constant 0 : index
    %12 = vector.load %arg3[%c0_9, %c0_10] : memref<1x128xf32, #tpu.memory_space<vmem>>, vector<1x128xf32>
    %13 = vector.broadcast %12 : vector<1x128xf32> to vector<8x128xf32>
    %14 = arith.addf %11, %13 : vector<8x128xf32>
    %cst_11 = arith.constant 0.000000e+00 : f32
    %15 = vector.broadcast %cst_11 : f32 to vector<8x128xf32>
    %16 = arith.maximumf %14, %15 : vector<8x128xf32>
    %c0_12 = arith.constant 0 : index
    %c0_13 = arith.constant 0 : index
    %17 = vector.load %arg4[%c0_12, %c0_13] : memref<8x128xf32, #tpu.memory_space<vmem>>, vector<8x128xf32>
    %18 = tpu.transpose %16, [1, 0] : vector<8x128xf32> -> vector<128x8xf32>
    %cst_14 = arith.constant dense<0.000000e+00> : vector<8x8xf32>
    %19 = tpu.matmul %17, %18, %cst_14 {dimension_numbers = #tpu.dot_dimension_numbers<[1], [0], [0], [1], [0, 0, 1, 1], [], []>} : vector<8x128xf32>, vector<128x8xf32>, vector<8x8xf32> -> vector<8x8xf32>
    %c0_15 = arith.constant 0 : index
    %c0_16 = arith.constant 0 : index
    %20 = vector.load %arg5[%c0_15, %c0_16] : memref<8x1xf32, #tpu.memory_space<vmem>>, vector<8x1xf32>
    %21 = vector.broadcast %20 : vector<8x1xf32> to vector<8x8xf32>
    %22 = arith.addf %19, %21 : vector<8x8xf32>
    %c0_17 = arith.constant 0 : index
    %c0_18 = arith.constant 0 : index
    %23 = vector.load %arg6[%c0_17, %c0_18] : memref<8x8xf32, #tpu.memory_space<vmem>>, vector<8x8xf32>
    tpu.vector_store %arg6[%c0_17, %c0_18], %22 {strides = array<i32>} : memref<8x8xf32, #tpu.memory_space<vmem>>, vector<8x8xf32>,
    return
  }
  func.func @transform_0(%arg0: i32) -> (i32, i32) {
    %c0_i32 = arith.constant 0 : i32
    %c0_i32_0 = arith.constant 0 : i32
    return %arg0, %c0_i32 : i32, i32
  }
  func.func @transform_1(%arg0: i32) -> (i32, i32) {
    %c0_i32 = arith.constant 0 : i32
    %c0_i32_0 = arith.constant 0 : i32
    %c0_i32_1 = arith.constant 0 : i32
    return %c0_i32, %c0_i32_0 : i32, i32
  }
  func.func @transform_2(%arg0: i32) -> (i32, i32) {
    %c0_i32 = arith.constant 0 : i32
    %c0_i32_0 = arith.constant 0 : i32
    %c0_i32_1 = arith.constant 0 : i32
    return %c0_i32, %c0_i32_0 : i32, i32
  }
  func.func @transform_3(%arg0: i32) -> (i32, i32) {
    %c0_i32 = arith.constant 0 : i32
    %c0_i32_0 = arith.constant 0 : i32
    %c0_i32_1 = arith.constant 0 : i32
    return %c0_i32, %c0_i32_0 : i32, i32
  }
  func.func @transform_4(%arg0: i32) -> (i32, i32) {
    %c0_i32 = arith.constant 0 : i32
    %c0_i32_0 = arith.constant 0 : i32
    %c0_i32_1 = arith.constant 0 : i32
    return %c0_i32, %c0_i32_0 : i32, i32
  }
  func.func @transform_5(%arg0: i32) -> (i32, i32) {
    %c0_i32 = arith.constant 0 : i32
    %c0_i32_0 = arith.constant 0 : i32
    return %c0_i32, %arg0 : i32, i32
  }
}

</mosaic_0001>

<bundles_post_ra>
// kernel: _cnn_apply.1
= control target key start
LH: loop header
LB: loop body
LE: loop exit
PB: predicated region body
PF: predicated region fallthrough
CT: control target
= control target key end

     0   :  { %10 = vsyncpa [#allocation3], 0  ;;  %s792_s0 = inlined_call_operand.vmem [shape: f32[8,64], index: 0, kind: input, shape index: {}]   ;;  %s793_s1 = inlined_call_operand.hbm [shape: f32[64,512], index: 1, kind: input, shape index: {}]   ;;  %s794_s2 = inlined_call_operand.vmem [shape: f32[1,128], index: 2, kind: input, shape index: {}]   ;;  %s795_s3 = inlined_call_operand.vmem [shape: f32[8,128], index: 3, kind: input, shape index: {}]   ;;  %s796_s4 = inlined_call_operand.vmem [shape: f32[8,1], index: 4, kind: input, shape index: {}]   ;;  %s797_s5 = inlined_call_operand.hbm [shape: f32[8,8], index: 5, kind: output, shape index: {}]  }
   0x1   :  { %11 = vsyncpa [#allocation4], 0  ;;  %s687_s18 = smov [#allocation2]   ;;  %s639_s22 = scalar_lea.hbm %s793_s1, 4096 }
   0x2   :  { %s19_s19 = sshll.u32 %s687_s18, 4  ;;  %p640_p0 = scmp.ne.s32.totalorder %s793_s1, %s639_s22  ;;  %s20_s19 = int_to_ptr.vmem [resolvable:$true] %s19_s19 }
   0x3   :  { %p643_p1 = scmp.lt.u32.totalorder %s639_s22, %s793_s1 }
   0x5   :  { %p645_p2 = pnand %p643_p1, %p640_p0 }
   0x7   :  { %648 = shalt.err (!%p645_p2)
}
   0x8   :  { %s649_s27 = scalar_lea.vmem %s20_s19, 4096  ;;  %p654_p4 = scmp.lt.s32.totalorder %s20_s19, %s20_s19 }
   0x9   :  { %p650_p3 = scmp.ne.s32.totalorder %s20_s19, %s649_s27  ;;  %p655_p5 = scmp.lt.s32.totalorder %s649_s27, %s649_s27 }
   0xb   :  { %p656_p6 = por %p655_p5, %p654_p4 }
   0xd   :  { %p657_p7 = pnand %p656_p6, %p650_p3 }
   0xf   :  { %660 = shalt.err (!%p657_p7)
}
  0x10   :  { %s688_s28 = smov 512   ;;  %s689_s29 = smov 32  }
  0x11   :  { %25 = dma.hbm_to_vmem [thread:$0]  %s793_s1, 4096, %s20_s19, [#allocation3], %s688_s28, %s688_s28, %s689_s29  }
  0x12   :  { %683 = dma.done.wait [#allocation3], 4096  }
  0x13   :  { %684 = vsyncadd [#allocation3], 4294963200  ;;  %v690_v0 = vmov 0.0|0.0   ;;  %vm691_vm0 = vmmov 0   ;;  %v692_v1 = vmov 0.0   ;;  %v36_v2 = vld [vmem:[#allocation2] sm:$0xff] }
  0x14   :  { %582 = vmatprep.subr.bf16.mxu0 %v690_v0  ;;  %594 = vmatprep.subr.bf16.mxu1 %v690_v0  ;;  %v37_v3 = vld [vmem:[#allocation2 + $0x20] sm:$0xff]  ;;  %v118_v4 = vld [vmem:[#allocation2 + $0x8] sm:$0xff]  ;;  %v197_v26 = vld [vmem:[#allocation2 + $0x10] sm:$0xff]  ;;  %vm44_vm1 = vcmask 523264   ;;  %v693_v52 = vmov 0   ;;  %s694_s12 = smov [#allocation5]  }
  0x15   :  { %517 = vmatprep.mubr.msk.f32.mxu0 %vm691_vm0, %v692_v1  ;;  %536 = vmatprep.mubr.msk.f32.mxu1 %vm691_vm0, %v692_v1  ;;  %v583_v5 = vpack.c.bf16 %v37_v3, %v36_v2  ;;  %v119_v6 = vld [vmem:[#allocation2 + $0x28] sm:$0xff]  ;;  %v38_v7 = vld [vmem:[#allocation2 + $0x40] sm:$0xff]  ;;  %v198_v27 = vld [vmem:[#allocation2 + $0x30] sm:$0xff]  ;;  %s449_s13 = sshll.u32 %s694_s12, 4  ;;  %vm441_vm2 = vcmask 64512   ;;  %s450_s13 = int_to_ptr.vmem [resolvable:$true] %s449_s13 }
  0x16   :  { %v39_v8 = vld [vmem:[#allocation2 + $0x60] sm:$0xff]  ;;  %v595_v9 = vpack.c.bf16 %v119_v6, %v118_v4  ;;  %v120_v10 = vld [vmem:[#allocation2 + $0x48] sm:$0xff]  ;;  %v276_v28 = vld [vmem:[#allocation2 + $0x18] sm:$0xff]  ;;  %v607_v31 = vpack.c.bf16 %v198_v27, %v197_v26  ;;  %638 = vset.pattern.permute.xlu0 %v693_v52  ;;  %p666_p9 = scmp.lt.s32.totalorder %s450_s13, %s450_s13 }
  0x17   :  { %v121_v11 = vld [vmem:[#allocation2 + $0x68] sm:$0xff]  ;;  %584 = vmatpush3.bf16.msra.mxu0 %v583_v5  ;;  %v586_v12 = vpack.c.bf16 %v39_v8, %v38_v7  ;;  %v40_v14 = vld [vmem:[#allocation2 + $0x80] sm:$0xff]  ;;  %v277_v29 = vld [vmem:[#allocation2 + $0x38] sm:$0xff] }
  0x18   :  { %596 = vmatpush3.bf16.msra.mxu1 %v595_v9  ;;  %585 = vmatprep.subr.bf16.mxu0 %v690_v0  ;;  %v598_v13 = vpack.c.bf16 %v121_v11, %v120_v10  ;;  %v41_v15 = vld [vmem:[#allocation2 + $0xa0] sm:$0xff]  ;;  %v122_v16 = vld [vmem:[#allocation2 + $0x88] sm:$0xff]  ;;  %v35_v30 = vld [vmem:[%s792_s0] sm:$0xff]  ;;  %v619_v32 = vpack.c.bf16 %v277_v29, %v276_v28 }
  0x19   :  { %597 = vmatprep.subr.bf16.mxu1 %v690_v0  ;;  %v123_v17 = vld [vmem:[#allocation2 + $0xa8] sm:$0xff]  ;;  %v589_v18 = vpack.c.bf16 %v41_v15, %v40_v14  ;;  %v42_v20 = vld [vmem:[#allocation2 + $0xc0] sm:$0xff]  ;;  %v199_v33 = vld [vmem:[#allocation2 + $0x50] sm:$0xff] }
  0x1a   :  { %v601_v19 = vpack.c.bf16 %v123_v17, %v122_v16  ;;  %v43_v21 = vld [vmem:[#allocation2 + $0xe0] sm:$0xff]  ;;  %v124_v22 = vld [vmem:[#allocation2 + $0xc8] sm:$0xff]  ;;  %v200_v34 = vld [vmem:[#allocation2 + $0x70] sm:$0xff] }
  0x1b   :  { %587 = vmatpush3.bf16.msra.mxu0 %v586_v12  ;;  %v125_v23 = vld [vmem:[#allocation2 + $0xe8] sm:$0xff]  ;;  %v592_v24 = vpack.c.bf16 %v43_v21, %v42_v20  ;;  %v278_v35 = vld [vmem:[#allocation2 + $0x58] sm:$0xff]  ;;  %v610_v37 = vpack.c.bf16 %v200_v34, %v199_v33  ;;  %v201_v39 = vld [vmem:[#allocation2 + $0x90] sm:$0xff] }
  0x1c   :  { %599 = vmatpush3.bf16.msra.mxu1 %v598_v13  ;;  %588 = vmatprep.subr.bf16.mxu0 %v690_v0  ;;  %v604_v25 = vpack.c.bf16 %v125_v23, %v124_v22  ;;  %v279_v36 = vld [vmem:[#allocation2 + $0x78] sm:$0xff]  ;;  %v202_v40 = vld [vmem:[#allocation2 + $0xb0] sm:$0xff] }
  0x1d   :  { %600 = vmatprep.subr.bf16.mxu1 %v690_v0  ;;  %v622_v38 = vpack.c.bf16 %v279_v36, %v278_v35  ;;  %v280_v41 = vld [vmem:[#allocation2 + $0x98] sm:$0xff]  ;;  %v613_v43 = vpack.c.bf16 %v202_v40, %v201_v39  ;;  %v203_v45 = vld [vmem:[#allocation2 + $0xd0] sm:$0xff] }
  0x1e   :  { %v281_v42 = vld [vmem:[#allocation2 + $0xb8] sm:$0xff]  ;;  %v204_v46 = vld [vmem:[#allocation2 + $0xf0] sm:$0xff] }
  0x1f   :  { %590 = vmatpush3.bf16.msra.mxu0 %v589_v18  ;;  %v625_v44 = vpack.c.bf16 %v281_v42, %v280_v41  ;;  %v282_v47 = vld [vmem:[#allocation2 + $0xd8] sm:$0xff]  ;;  %v616_v49 = vpack.c.bf16 %v204_v46, %v203_v45 }
  0x20   :  { %602 = vmatpush3.bf16.msra.mxu1 %v601_v19  ;;  %591 = vmatprep.subr.bf16.mxu0 %v690_v0  ;;  %v283_v48 = vld [vmem:[#allocation2 + $0xf8] sm:$0xff] }
  0x21   :  { %603 = vmatprep.subr.bf16.mxu1 %v690_v0  ;;  %v628_v50 = vpack.c.bf16 %v283_v48, %v282_v47  ;;  %v365_v51 = vld [vmem:[%s796_s4] sm:$0xff] }
  0x22   :  { %368 = vperm.xlu0 %638, %v365_v51   ;;  %v462_v62 = vld [vmem:[%s794_s2] ss:$0 sm:$0xff]  ;;  %s661_s2 = scalar_lea.vmem %s450_s13, 128 }
  0x23   :  { %593 = vmatpush3.bf16.msra.mxu0 %v592_v24  ;;  %v364_v3 = vld [vmem:[%s795_s3] sm:$0xff]  ;;  %p662_p8 = scmp.ne.s32.totalorder %s450_s13, %s661_s2  ;;  %p667_p10 = scmp.lt.s32.totalorder %s661_s2, %s661_s2 }
  0x24   :  { %605 = vmatpush3.bf16.msra.mxu1 %v604_v25  ;;  %606 = vmatprep.subr.bf16.mxu0 %v690_v0 }
  0x25   :  { %618 = vmatprep.subr.bf16.mxu1 %v690_v0  ;;  %p668_p11 = por %p667_p10, %p666_p9 }
  0x26   :  { %518 = vmatmul.mubr.msk.f32.vlgmr.msra.gmra.mrb[0].mxu0 %vm44_vm1, %v35_v30 }
  0x27   :  { %537 = vmatmul.mubr.msk.f32.vlgmr.msra.gmra.mrb[0].mxu1 %vm44_vm1, %v35_v30  ;;  %608 = vmatpush3.bf16.msra.mxu0 %v607_v31  ;;  %p669_p12 = pnand %p668_p11, %p662_p8 }
  0x28   :  { %620 = vmatpush3.bf16.msra.mxu1 %v619_v32  ;;  %609 = vmatprep.subr.bf16.mxu0 %v690_v0 }
  0x29   :  { %621 = vmatprep.subr.bf16.mxu1 %v690_v0  ;;  %555 = vmatprep.mubr.msk.f32.mxu0 %vm691_vm0, %v692_v1 }
  0x2a   :  { %574 = vmatprep.mubr.msk.f32.mxu1 %vm691_vm0, %v692_v1 }
  0x2b   :  { %611 = vmatpush3.bf16.msra.mxu0 %v610_v37 }
  0x2c   :  { %623 = vmatpush3.bf16.msra.mxu1 %v622_v38  ;;  %612 = vmatprep.subr.bf16.mxu0 %v690_v0 }
  0x2d   :  { %624 = vmatprep.subr.bf16.mxu1 %v690_v0 }
  0x2f   :  { %614 = vmatpush3.bf16.msra.mxu0 %v613_v43 }
  0x30   :  { %626 = vmatpush3.bf16.msra.mxu1 %v625_v44  ;;  %615 = vmatprep.subr.bf16.mxu0 %v690_v0 }
  0x31   :  { %627 = vmatprep.subr.bf16.mxu1 %v690_v0 }
  0x33   :  { %617 = vmatpush3.bf16.msra.mxu0 %v616_v49 }
  0x34   :  { %629 = vmatpush3.bf16.msra.mxu1 %v628_v50  ;;  %577 = vmatprep.subr.mxu0 %v692_v1 }
  0x36   :  { %556 = vmatmul.mubr.msk.f32.vlgmr.msra.gmra.mrb[2].mxu0 %vm44_vm1, %v35_v30 }
  0x37   :  { %575 = vmatmul.mubr.msk.f32.vlgmr.msra.gmra.mrb[2].mxu1 %vm44_vm1, %v35_v30  ;;  %579 = vmatprep.mubr.msk.f32.mxu0 %vm691_vm0, %v692_v1 }
  0xa1   :  { %v369_v4 = vpop.permute.xlu0 %368 }
  0xf9   :  { %v114_v53 = vpop.f32.mrb[0].mxu0 }
  0xfa   :  { %v519_v54 = vpop.f32.mrb[1].mxu0  ;;  %v192_v55 = vpop.f32.mrb[0].mxu1 }
  0xfb   :  { %v196_v56 = vmax.f32 %v114_v53, %v192_v55  ;;  %v538_v57 = vpop.f32.mrb[1].mxu1 }
 0x109   :  { %v271_v58 = vpop.f32.mrb[2].mxu0 }
 0x10a   :  { %v275_v59 = vmax.f32 %v196_v56, %v271_v58  ;;  %v557_v60 = vpop.f32.mrb[3].mxu0  ;;  %v350_v61 = vpop.f32.mrb[2].mxu1 }
 0x10b   :  { %v576_v63 = vpop.f32.mrb[3].mxu1 }
 0x10c   :  { %v354_v0 = vmax.f32 %v275_v59, %v350_v61 }
 0x10e   :  { %v362_v1 = vadd.f32 %v462_v62, %v354_v0 }
 0x110   :  { %v363_v2 = vmax.f32 %v362_v1, 0.0 }
 0x112   :  { %578 = vmatpush3.xpose.msra.mxu0 %v363_v2 }
 0x115   :  { %580 = vmatmul.mubr.f32.vlgmr.msra.gmra.mrb[4].mxu0 %v364_v3 }
 0x1e8   :  { %v437_v5 = vpop.f32.mrb[4].mxu0 }
 0x1e9   :  { %v438_v6 = vadd.f32 %v437_v5, %v369_v4  ;;  %v581_v7 = vpop.f32.mrb[5].mxu0 }
 0x1eb   :  { %442 = vst.msk [vmem:[#allocation5] sm:$0xff] %vm441_vm2, %v438_v6 }
 0x1ec   :  { %672 = shalt.err (!%p669_p12)
}
 0x1ed   :  { %s673_s3 = scalar_lea.hbm %s797_s5, 128 }
 0x1ee   :  { %p674_p13 = scmp.ne.s32.totalorder %s797_s5, %s673_s3  ;;  %p677_p0 = scmp.lt.u32.totalorder %s673_s3, %s797_s5 }
 0x1f0   :  { %p679_p1 = pnand %p677_p0, %p674_p13 }
 0x1f2   :  { %682 = shalt.err (!%p679_p1)
}
 0x1f3   :  { %452 = dma.vmem_to_hbm [thread:$0]  %s450_s13, 128, %s797_s5, [#allocation4]  }
 0x1f4   :  { %685 = dma.done.wait [#allocation4], 128  }
 0x1f5   :  { %686 = vsyncadd [#allocation4], 4294967168 }
 0x1f6   :  { %456 = vsyncpa [#allocation3], 1 }
 0x1f7   :  { %457 = vsyncpa [#allocation4], 1 }

</bundles_post_ra>
